<compile_context>
chip_gen: v7x
topology: tpu7x:2x2x1
jax: 0.10.0
libtpu: 0.0.40
codegen_flags: <defaults>
</compile_context>

<pallas_src>
import functools

import jax
import jax.numpy as jnp
import numpy as np
from jax.experimental import pallas as pl
from jax.experimental.pallas import tpu as pltpu


def _round_up(x, m):
    return (x + m - 1) // m * m


# ---------------------------------------------------------------------------
# Kernel
# ---------------------------------------------------------------------------
def _inception_kernel(x_ref, w1_ref, wshift_ref, btab_ref, o_ref, *, f, c_out_pad):
    B, L, C = x_ref.shape
    BL = B * L
    CP = c_out_pad
    wdt = w1_ref.dtype

    x3 = x_ref[...]                               # (B, L, C_in)
    xf = x3.reshape(BL, C)

    # ---- branch-5 maxpool (k=3, s=1, pad=1), per sample ---------------------
    neg = jnp.full((B, 1, C), -jnp.inf, x3.dtype)
    xp = jnp.concatenate([neg, x3, neg], axis=1)  # (B, L+2, C)
    pooled = jnp.maximum(jnp.maximum(xp[:, 0:L], xp[:, 1:L + 1]), xp[:, 2:L + 2])
    pooledf = pooled.reshape(BL, C)

    # ---- stage 1: one (2*BL, C_in) @ (C_in, CP) MXU pass ---------------------
    # columns of w1_ref: [0:3f]=w1 | [3f:5f]=w2a | [5f:7f]=w3a | [7f:9f]=w4a
    #                    | [9f:12f]=w4_res | [12f:15f]=w5 | pad
    lhs = jnp.concatenate([xf, pooledf], axis=0)  # stack pooled branch along M
    y = jnp.dot(lhs, w1_ref[...], preferred_element_type=jnp.float32)
    yx = y[0:BL]                                  # x-half
    yp = y[BL:2 * BL]                             # pooled-half (only w5 cols used)

    # direct-to-output contributions (w1, w4_res from x; w5 from pooled)
    col = jax.lax.broadcasted_iota(jnp.int32, (1, CP), 1)
    keep_x = (col < 3 * f) | ((col >= 9 * f) & (col < 12 * f))
    keep_p = (col >= 12 * f) & (col < 15 * f)
    out_acc = jnp.where(keep_p, yp, jnp.where(keep_x, yx, 0.0))      # (BL, CP) f32

    # heads live at cols [3f:9f]; all other cols hit zero RHS rows later, so no
    # masking is needed here — keep the full CP width lane-dense.
    xh = jnp.maximum(yx + btab_ref[0:1, :], 0.0).astype(wdt)         # (BL, CP)

    # ---- k=3 / k=5 "same" convs as shifted matmuls (per-sample zero pad) -----
    xh3 = xh.reshape(B, L, CP)
    zpad = jnp.zeros((B, 2, CP), wdt)
    xhp = jnp.concatenate([zpad, xh3, zpad], axis=1)                 # (B, L+4, CP)

    h4b_acc = jnp.zeros((BL, CP), jnp.float32)
    for t in range(5):
        win = xhp[:, t:t + L, :].reshape(BL, CP)
        # wshift[t]: branch-3 tap t -> out cols [6f:9f]; branch-2 tap t-1 (1<=t<=3)
        # -> out cols [3f:6f]; zero rows everywhere except the matching head.
        out_acc = out_acc + jnp.dot(win, wshift_ref[t],
                                    preferred_element_type=jnp.float32)
        if 1 <= t <= 3:
            # wshift[4+t]: branch-4 k=3 conv tap t-1 -> cols [0:4f] of h4b_acc
            h4b_acc = h4b_acc + jnp.dot(win, wshift_ref[4 + t],
                                        preferred_element_type=jnp.float32)

    # branch-4 intermediate BN+ReLU, then 1x1 (4f->3f) placed at out cols [9f:12f]
    h4b = jnp.maximum(h4b_acc + btab_ref[1:2, :], 0.0).astype(wdt)
    out_acc = out_acc + jnp.dot(h4b, wshift_ref[8],
                                preferred_element_type=jnp.float32)

    # ---- single fused output bias + ReLU, lane-dense writeback --------------
    out = jnp.maximum(out_acc + btab_ref[2:3, :], 0.0)
    o_ref[...] = out.reshape(B, L, CP).astype(o_ref.dtype)


# ---------------------------------------------------------------------------
# Parameter construction (deterministic, BN folded into conv scale + shift)
# ---------------------------------------------------------------------------
def _bn_fold(key, cout, eps=1e-5):
    k1, k2, k3, k4 = jax.random.split(key, 4)
    gamma = jax.random.uniform(k1, (cout,), minval=0.5, maxval=1.5, dtype=jnp.float32)
    beta = 0.1 * jax.random.normal(k2, (cout,), dtype=jnp.float32)
    mean = 0.1 * jax.random.normal(k3, (cout,), dtype=jnp.float32)
    var = jax.random.uniform(k4, (cout,), minval=0.5, maxval=1.5, dtype=jnp.float32)
    scale = gamma / jnp.sqrt(var + eps)
    shift = beta - mean * scale
    return scale, shift.reshape(1, cout)


def init_params(key, c_in, f):
    keys = iter(jax.random.split(key, 32))
    p = {}

    def conv_w(shape):
        return 0.1 * jax.random.normal(next(keys), shape, dtype=jnp.float32)

    s, b = _bn_fold(next(keys), 3 * f)                         # branch 1
    p["w1"], p["b1"] = conv_w((c_in, 3 * f)) * s[None, :], b
    s, b = _bn_fold(next(keys), 2 * f)                         # branch 2 head
    p["w2a"], p["b2a"] = conv_w((c_in, 2 * f)) * s[None, :], b
    s, b = _bn_fold(next(keys), 3 * f)                         # branch 2 k=3
    p["w2b"], p["b2b"] = conv_w((3, 2 * f, 3 * f)) * s[None, None, :], b
    s, b = _bn_fold(next(keys), 2 * f)                         # branch 3 head
    p["w3a"], p["b3a"] = conv_w((c_in, 2 * f)) * s[None, :], b
    s, b = _bn_fold(next(keys), 3 * f)                         # branch 3 k=5
    p["w3b"], p["b3b"] = conv_w((5, 2 * f, 3 * f)) * s[None, None, :], b
    p["w4a"] = conv_w((c_in, 2 * f))                           # branch 4 head (no BN)
    s, b = _bn_fold(next(keys), 4 * f)                         # branch 4 k=3
    p["w4b"], p["b4b"] = conv_w((3, 2 * f, 4 * f)) * s[None, None, :], b
    s, b = _bn_fold(next(keys), 3 * f)                         # branch 4 1x1
    p["w4c"], p["b4c"] = conv_w((4 * f, 3 * f)) * s[None, :], b
    s, b = _bn_fold(next(keys), 3 * f)                         # branch 4 residual
    p["w4r"], p["b4r"] = conv_w((c_in, 3 * f)) * s[None, :], b
    s, b = _bn_fold(next(keys), 3 * f)                         # branch 5 (pool) 1x1
    p["w5"], p["b5"] = conv_w((c_in, 3 * f)) * s[None, :], b
    return p


# ---------------------------------------------------------------------------
# Host-side parameter packing into full lane-dense (CP-wide) matrices
# ---------------------------------------------------------------------------
def _pack_params(params, c_in, f, dtype):
    cp = _round_up(15 * f, 128)

    def place_cols(w, c0):
        return jnp.pad(w, ((0, 0), (c0, cp - c0 - w.shape[1])))

    # stage-1 fused weight (C_in, CP); heads fit exactly in the [3f:9f] gap.
    w1 = (place_cols(params["w1"], 0) + place_cols(params["w2a"], 3 * f)
          + place_cols(params["w3a"], 5 * f) + place_cols(params["w4a"], 7 * f)
          + place_cols(params["w4r"], 9 * f) + place_cols(params["w5"], 12 * f))
    w1 = w1.astype(dtype)

    # second-stage weights: 9 full (CP, CP) lane-dense matrices.
    mats = []
    for t in range(5):                           # window offset in the pad-2 buffer
        m = jnp.zeros((cp, cp), jnp.float32)
        if 1 <= t <= 3:                          # branch-2 k=3 tap -> out [3f:6f]
            m = m.at[3 * f:5 * f, 3 * f:6 * f].set(params["w2b"][t - 1])
        m = m.at[5 * f:7 * f, 6 * f:9 * f].set(params["w3b"][t])   # branch-3 k=5
        mats.append(m)
    for t in range(3):                           # branch-4 k=3 conv -> cols [0:4f]
        m = jnp.zeros((cp, cp), jnp.float32)
        m = m.at[7 * f:9 * f, 0:4 * f].set(params["w4b"][t])
        mats.append(m)
    m = jnp.zeros((cp, cp), jnp.float32)         # branch-4 1x1 (4f->3f) -> [9f:12f]
    m = m.at[0:4 * f, 9 * f:12 * f].set(params["w4c"])
    mats.append(m)
    wshift = jnp.stack(mats, axis=0).astype(dtype)               # (9, CP, CP)

    # bias table (8, CP), kept f32 (matmuls accumulate in f32).
    def brow(pairs):
        r = jnp.zeros((1, cp), jnp.float32)
        for b, c0 in pairs:
            r = r.at[:, c0:c0 + b.shape[1]].set(b)
        return r

    btab = jnp.concatenate(
        [brow([(params["b2a"], 3 * f), (params["b3a"], 5 * f)]),          # heads
         brow([(params["b4b"], 0)]),                                      # h4b
         brow([(params["b1"], 0), (params["b2b"], 3 * f), (params["b3b"], 6 * f),
               (params["b4c"] + params["b4r"], 9 * f), (params["b5"], 12 * f)])]
        + [jnp.zeros((1, cp), jnp.float32)] * 5, axis=0)                  # (8, CP)
    return w1, wshift, btab


# ---------------------------------------------------------------------------
# Tile sizing (VMEM-budgeted, per TPU generation)
# ---------------------------------------------------------------------------
def _default_vmem_budget():
    # v7x has 64 MiB VMEM per TensorCore -> conservative activation-tile budget;
    # v5e / v6e have 128 MiB -> roughly 2x the tile.
    try:
        kind = jax.devices()[0].device_kind.lower()
    except Exception:  # pragma: no cover
        kind = ""
    return (20 << 20) if "7" in kind else (40 << 20)


def _pick_batch_tile(n, length, c_in, c_out_pad, in_isz, out_isz, budget):
    # approximate per-row live set: double-buffered in/out blocks, two f32
    # accumulators, and ~8 CP-wide compute-dtype intermediates (y/xh/windows).
    per_row = (2 * c_in * in_isz + 2 * c_out_pad * out_isz
               + 2 * c_out_pad * 4 + 8 * c_out_pad * in_isz)
    max_rows = max(length, budget // max(per_row, 1))
    max_bt = max(1, max_rows // length)
    divisors = [d for d in range(1, n + 1) if n % d == 0 and d <= max_bt] or [1]
    # prefer >= 2 grid steps so v7x's two TensorCores both get work (and the
    # in/out pipeline has something to overlap); no effect on v5e/v6e.
    multi = [d for d in divisors if n // d >= 2]
    return max(multi) if multi else max(divisors)


# ---------------------------------------------------------------------------
# Wrappers
# ---------------------------------------------------------------------------
def inception_block_nlc(x_nlc, params, filter_size, *, compute_dtype=jnp.float32,
                        out_dtype=None, batch_tile=None, vmem_budget_bytes=None):
    """Fast path: x_nlc is (N, L, C_in); returns (N, L, 15*filter_size)."""
    n, length, c_in = x_nlc.shape
    f = filter_size
    c_out = 15 * f
    cp = _round_up(c_out, 128)
    out_dtype = compute_dtype if out_dtype is None else out_dtype

    if vmem_budget_bytes is None:
        vmem_budget_bytes = _default_vmem_budget()
    if batch_tile is None:
        batch_tile = _pick_batch_tile(n, length, c_in, cp,
                                      jnp.dtype(compute_dtype).itemsize,
                                      jnp.dtype(out_dtype).itemsize,
                                      vmem_budget_bytes)
    assert n % batch_tile == 0, (n, batch_tile)

    w1, wshift, btab = _pack_params(params, c_in, f, compute_dtype)
    x = x_nlc.astype(compute_dtype)

    kernel = functools.partial(_inception_kernel, f=f, c_out_pad=cp)
    out = pl.pallas_call(
        kernel,
        out_shape=jax.ShapeDtypeStruct((n, length, cp), out_dtype),
        grid=(n // batch_tile,),
        in_specs=[
            pl.BlockSpec((batch_tile, length, c_in), lambda i: (i, 0, 0)),
            pl.BlockSpec(w1.shape, lambda i: (0, 0)),        # grid-invariant params:
            pl.BlockSpec(wshift.shape, lambda i: (0, 0, 0)),  # constant index_map ->
            pl.BlockSpec(btab.shape, lambda i: (0, 0)),       # DMA'd once
        ],
        out_specs=pl.BlockSpec((batch_tile, length, cp), lambda i: (i, 0, 0)),
        compiler_params=pltpu.CompilerParams(
            dimension_semantics=("parallel",),
            vmem_limit_bytes=int(vmem_budget_bytes + (16 << 20)),
        ),
    )(x, w1, wshift, btab)
    return out[:, :, :c_out]


def inception_block(x_ncl, params, filter_size, **kw):
    """PyTorch-layout wrapper: x_ncl is (N, C_in, L); returns (N, 15*f, L).

    NOTE: the boundary transposes exist only to match the PyTorch NCL contract; a
    fused consumer should call inception_block_nlc directly (NLC in / NLC out).
    """
    x_nlc = jnp.transpose(x_ncl, (0, 2, 1))
    out_nlc = inception_block_nlc(x_nlc, params, filter_size, **kw)
    return jnp.transpose(out_nlc, (0, 2, 1))


# ---------------------------------------------------------------------------
# Pure-JAX reference (same math, no Pallas) for correctness check
# ---------------------------------------------------------------------------
def _reference(x_ncl, p):
    x = jnp.transpose(x_ncl, (0, 2, 1))   # (N, L, C)
    relu = lambda v: jnp.maximum(v, 0.0)

    def conv1(h, w, b=None):
        y = jnp.einsum("nlc,co->nlo", h, w)
        return y if b is None else y + b

    def convk(h, w, b):
        k = w.shape[0]
        pad = (k - 1) // 2
        hp = jnp.pad(h, ((0, 0), (pad, pad), (0, 0)))
        L = h.shape[1]
        y = sum(jnp.einsum("nlc,co->nlo", hp[:, t:t + L], w[t]) for t in range(k))
        return y + b

    br1 = relu(conv1(x, p["w1"], p["b1"]))
    br2 = relu(convk(relu(conv1(x, p["w2a"], p["b2a"])), p["w2b"], p["b2b"]))
    br3 = relu(convk(relu(conv1(x, p["w3a"], p["b3a"])), p["w3b"], p["b3b"]))
    h4 = relu(conv1(x, p["w4a"]))
    h4 = relu(convk(h4, p["w4b"], p["b4b"]))
    h4 = conv1(h4, p["w4c"], p["b4c"])
    br4 = relu(h4 + conv1(x, p["w4r"], p["b4r"]))
    xp = jnp.pad(x, ((0, 0), (1, 1), (0, 0)), constant_values=-jnp.inf)
    L = x.shape[1]
    pooled = jnp.maximum(jnp.maximum(xp[:, 0:L], xp[:, 1:L + 1]), xp[:, 2:L + 2])
    br5 = relu(conv1(pooled, p["w5"], p["b5"]))
    out = jnp.concatenate([br1, br2, br3, br4, br5], axis=2)
    return jnp.transpose(out, (0, 2, 1))


# ---------------------------------------------------------------------------
if __name__ == "__main__":
    # Small shapes consistent with the module: x is (N, c_in, L) like PyTorch NCL.
    N, C_IN, L = 2, 32, 16
    FILTER_SIZE = 8

    key = jax.random.PRNGKey(0)
    k_x, k_p = jax.random.split(key)
    x = jax.random.normal(k_x, (N, C_IN, L), dtype=jnp.float32)
    params = init_params(k_p, C_IN, FILTER_SIZE)

    ref = jax.block_until_ready(_reference(x, params))

    # f32 operand path — exact parity with the pure-JAX reference.
    run_f32 = jax.jit(functools.partial(inception_block, filter_size=FILTER_SIZE))
    out_f32 = jax.block_until_ready(run_f32(x, params))
    assert out_f32.shape == (N, 15 * FILTER_SIZE, L), out_f32.shape
    np.testing.assert_allclose(np.asarray(out_f32), np.asarray(ref),
                               atol=1e-4, rtol=1e-4)

    # bf16 operands + bf16 output (recommended production mode on v6e/v7x):
    # f32 accumulation; checked against the f32 reference with a loose tolerance.
    run_bf16 = jax.jit(functools.partial(inception_block, filter_size=FILTER_SIZE,
                                         compute_dtype=jnp.bfloat16))
    out_bf16 = jax.block_until_ready(run_bf16(x, params))
    assert out_bf16.shape == (N, 15 * FILTER_SIZE, L), out_bf16.shape
    np.testing.assert_allclose(np.asarray(out_bf16.astype(jnp.float32)),
                               np.asarray(ref), atol=0.15, rtol=0.15)

    print("KERNEL_OK")
</pallas_src>

<mosaic_0001>
module attributes {stable_mosaic.version = 11 : i64} {
  func.func @_inception_kernel(%arg0: i32, %arg1: memref<1x16x32xf32, #tpu.memory_space<vmem>>, %arg2: memref<32x128xf32, #tpu.memory_space<vmem>>, %arg3: memref<9x128x128xf32, #tpu.memory_space<vmem>>, %arg4: memref<8x128xf32, #tpu.memory_space<vmem>>, %arg5: memref<1x16x128xf32, #tpu.memory_space<vmem>>) attributes {dimension_semantics = [#tpu.dimension_semantics<parallel>], iteration_bounds = array<i64: 2>, scalar_prefetch = 0 : i64, scratch_operands = 0 : i64, tpu.core_type = #tpu.core_type<tc>, window_params = [{transform_indices = @transform_0, window_bounds = array<i64: 1, 16, 32>}, {pipeline_mode = #tpu.pipeline_mode<synchronous>, transform_indices = @transform_1, window_bounds = array<i64: 32, 128>}, {pipeline_mode = #tpu.pipeline_mode<synchronous>, transform_indices = @transform_2, window_bounds = array<i64: 9, 128, 128>}, {pipeline_mode = #tpu.pipeline_mode<synchronous>, transform_indices = @transform_3, window_bounds = array<i64: 8, 128>}, {transform_indices = @transform_4, window_bounds = array<i64: 1, 16, 128>}]} {
    %c0 = arith.constant 0 : index
    %c0_0 = arith.constant 0 : index
    %c0_1 = arith.constant 0 : index
    %0 = vector.load %arg1[%c0, %c0_0, %c0_1] : memref<1x16x32xf32, #tpu.memory_space<vmem>>, vector<1x16x32xf32>
    %1 = vector.shape_cast %0 : vector<1x16x32xf32> to vector<16x32xf32>
    %cst = arith.constant 0xFF800000 : f32
    %2 = vector.broadcast %cst : f32 to vector<1x1x32xf32>
    %3 = tpu.concatenate %2, %0, %2 in 1 : vector<1x1x32xf32>, vector<1x16x32xf32>, vector<1x1x32xf32> -> vector<1x18x32xf32>
    %4 = vector.extract_strided_slice %3 {offsets = [0, 0, 0], sizes = [1, 16, 32], strides = [1, 1, 1]} : vector<1x18x32xf32> to vector<1x16x32xf32>
    %5 = vector.extract_strided_slice %3 {offsets = [0, 1, 0], sizes = [1, 16, 32], strides = [1, 1, 1]} : vector<1x18x32xf32> to vector<1x16x32xf32>
    %6 = arith.maximumf %4, %5 : vector<1x16x32xf32>
    %7 = vector.extract_strided_slice %3 {offsets = [0, 2, 0], sizes = [1, 16, 32], strides = [1, 1, 1]} : vector<1x18x32xf32> to vector<1x16x32xf32>
    %8 = arith.maximumf %6, %7 : vector<1x16x32xf32>
    %9 = vector.shape_cast %8 : vector<1x16x32xf32> to vector<16x32xf32>
    %10 = tpu.concatenate %1, %9 in 0 : vector<16x32xf32>, vector<16x32xf32> -> vector<32x32xf32>
    %c0_2 = arith.constant 0 : index
    %c0_3 = arith.constant 0 : index
    %11 = vector.load %arg2[%c0_2, %c0_3] : memref<32x128xf32, #tpu.memory_space<vmem>>, vector<32x128xf32>
    %cst_4 = arith.constant dense<0.000000e+00> : vector<32x128xf32>
    %12 = tpu.matmul %10, %11, %cst_4 {dimension_numbers = #tpu.dot_dimension_numbers<[1], [0], [0], [1], [0, 0, 1, 1], [], []>} : vector<32x32xf32>, vector<32x128xf32>, vector<32x128xf32> -> vector<32x128xf32>
    %13 = vector.extract_strided_slice %12 {offsets = [0, 0], sizes = [16, 128], strides = [1, 1]} : vector<32x128xf32> to vector<16x128xf32>
    %14 = vector.extract_strided_slice %12 {offsets = [16, 0], sizes = [16, 128], strides = [1, 1]} : vector<32x128xf32> to vector<16x128xf32>
    %15 = tpu.iota {dimensions = array<i32: 1>} : vector<1x128xi32>
    %c24_i32 = arith.constant 24 : i32
    %16 = vector.broadcast %c24_i32 : i32 to vector<1x128xi32>
    %17 = arith.cmpi slt, %15, %16 : vector<1x128xi32>
    %c72_i32 = arith.constant 72 : i32
    %18 = vector.broadcast %c72_i32 : i32 to vector<1x128xi32>
    %19 = arith.cmpi sge, %15, %18 : vector<1x128xi32>
    %c96_i32 = arith.constant 96 : i32
    %20 = vector.broadcast %c96_i32 : i32 to vector<1x128xi32>
    %21 = arith.cmpi slt, %15, %20 : vector<1x128xi32>
    %22 = arith.andi %19, %21 : vector<1x128xi1>
    %23 = arith.ori %17, %22 : vector<1x128xi1>
    %c96_i32_5 = arith.constant 96 : i32
    %24 = vector.broadcast %c96_i32_5 : i32 to vector<1x128xi32>
    %25 = arith.cmpi sge, %15, %24 : vector<1x128xi32>
    %c120_i32 = arith.constant 120 : i32
    %26 = vector.broadcast %c120_i32 : i32 to vector<1x128xi32>
    %27 = arith.cmpi slt, %15, %26 : vector<1x128xi32>
    %28 = arith.andi %25, %27 : vector<1x128xi1>
    %cst_6 = arith.constant 0.000000e+00 : f32
    %29 = vector.shape_cast %23 : vector<1x128xi1> to vector<1x128xi1>
    %30 = vector.broadcast %29 : vector<1x128xi1> to vector<16x128xi1>
    %31 = vector.broadcast %cst_6 : f32 to vector<16x128xf32>
    %32 = arith.select %30, %13, %31 : vector<16x128xi1>, vector<16x128xf32>
    %33 = vector.shape_cast %28 : vector<1x128xi1> to vector<1x128xi1>
    %34 = vector.broadcast %33 : vector<1x128xi1> to vector<16x128xi1>
    %35 = arith.select %34, %14, %32 : vector<16x128xi1>, vector<16x128xf32>
    %c0_7 = arith.constant 0 : index
    %c0_8 = arith.constant 0 : index
    %36 = vector.load %arg4[%c0_7, %c0_8] : memref<8x128xf32, #tpu.memory_space<vmem>>, vector<1x128xf32>
    %37 = vector.broadcast %36 : vector<1x128xf32> to vector<16x128xf32>
    %38 = arith.addf %13, %37 : vector<16x128xf32>
    %cst_9 = arith.constant 0.000000e+00 : f32
    %39 = vector.broadcast %cst_9 : f32 to vector<16x128xf32>
    %40 = arith.maximumf %38, %39 : vector<16x128xf32>
    %41 = vector.shape_cast %40 : vector<16x128xf32> to vector<1x16x128xf32>
    %cst_10 = arith.constant 0.000000e+00 : f32
    %42 = vector.broadcast %cst_10 : f32 to vector<1x2x128xf32>
    %43 = tpu.concatenate %42, %41, %42 in 1 : vector<1x2x128xf32>, vector<1x16x128xf32>, vector<1x2x128xf32> -> vector<1x20x128xf32>
    %cst_11 = arith.constant 0.000000e+00 : f32
    %44 = vector.broadcast %cst_11 : f32 to vector<16x128xf32>
    %45 = vector.extract_strided_slice %43 {offsets = [0, 0, 0], sizes = [1, 16, 128], strides = [1, 1, 1]} : vector<1x20x128xf32> to vector<1x16x128xf32>
    %46 = vector.shape_cast %45 : vector<1x16x128xf32> to vector<16x128xf32>
    %c0_12 = arith.constant 0 : index
    %c0_13 = arith.constant 0 : index
    %c0_14 = arith.constant 0 : index
    %47 = vector.load %arg3[%c0_12, %c0_13, %c0_14] : memref<9x128x128xf32, #tpu.memory_space<vmem>>, vector<1x128x128xf32>
    %48 = vector.shape_cast %47 : vector<1x128x128xf32> to vector<128x128xf32>
    %cst_15 = arith.constant dense<0.000000e+00> : vector<16x128xf32>
    %49 = tpu.matmul %46, %48, %cst_15 {dimension_numbers = #tpu.dot_dimension_numbers<[1], [0], [0], [1], [0, 0, 1, 1], [], []>} : vector<16x128xf32>, vector<128x128xf32>, vector<16x128xf32> -> vector<16x128xf32>
    %50 = arith.addf %35, %49 : vector<16x128xf32>
    %51 = vector.extract_strided_slice %43 {offsets = [0, 1, 0], sizes = [1, 16, 128], strides = [1, 1, 1]} : vector<1x20x128xf32> to vector<1x16x128xf32>
    %52 = vector.shape_cast %51 : vector<1x16x128xf32> to vector<16x128xf32>
    %c1 = arith.constant 1 : index
    %c0_16 = arith.constant 0 : index
    %c0_17 = arith.constant 0 : index
    %53 = vector.load %arg3[%c1, %c0_16, %c0_17] : memref<9x128x128xf32, #tpu.memory_space<vmem>>, vector<1x128x128xf32>
    %54 = vector.shape_cast %53 : vector<1x128x128xf32> to vector<128x128xf32>
    %cst_18 = arith.constant dense<0.000000e+00> : vector<16x128xf32>
    %55 = tpu.matmul %52, %54, %cst_18 {dimension_numbers = #tpu.dot_dimension_numbers<[1], [0], [0], [1], [0, 0, 1, 1], [], []>} : vector<16x128xf32>, vector<128x128xf32>, vector<16x128xf32> -> vector<16x128xf32>
    %56 = arith.addf %50, %55 : vector<16x128xf32>
    %c5 = arith.constant 5 : index
    %c0_19 = arith.constant 0 : index
    %c0_20 = arith.constant 0 : index
    %57 = vector.load %arg3[%c5, %c0_19, %c0_20] : memref<9x128x128xf32, #tpu.memory_space<vmem>>, vector<1x128x128xf32>
    %58 = vector.shape_cast %57 : vector<1x128x128xf32> to vector<128x128xf32>
    %cst_21 = arith.constant dense<0.000000e+00> : vector<16x128xf32>
    %59 = tpu.matmul %52, %58, %cst_21 {dimension_numbers = #tpu.dot_dimension_numbers<[1], [0], [0], [1], [0, 0, 1, 1], [], []>} : vector<16x128xf32>, vector<128x128xf32>, vector<16x128xf32> -> vector<16x128xf32>
    %60 = arith.addf %44, %59 : vector<16x128xf32>
    %61 = vector.extract_strided_slice %43 {offsets = [0, 2, 0], sizes = [1, 16, 128], strides = [1, 1, 1]} : vector<1x20x128xf32> to vector<1x16x128xf32>
    %62 = vector.shape_cast %61 : vector<1x16x128xf32> to vector<16x128xf32>
    %c2 = arith.constant 2 : index
    %c0_22 = arith.constant 0 : index
    %c0_23 = arith.constant 0 : index
    %63 = vector.load %arg3[%c2, %c0_22, %c0_23] : memref<9x128x128xf32, #tpu.memory_space<vmem>>, vector<1x128x128xf32>
    %64 = vector.shape_cast %63 : vector<1x128x128xf32> to vector<128x128xf32>
    %cst_24 = arith.constant dense<0.000000e+00> : vector<16x128xf32>
    %65 = tpu.matmul %62, %64, %cst_24 {dimension_numbers = #tpu.dot_dimension_numbers<[1], [0], [0], [1], [0, 0, 1, 1], [], []>} : vector<16x128xf32>, vector<128x128xf32>, vector<16x128xf32> -> vector<16x128xf32>
    %66 = arith.addf %56, %65 : vector<16x128xf32>
    %c6 = arith.constant 6 : index
    %c0_25 = arith.constant 0 : index
    %c0_26 = arith.constant 0 : index
    %67 = vector.load %arg3[%c6, %c0_25, %c0_26] : memref<9x128x128xf32, #tpu.memory_space<vmem>>, vector<1x128x128xf32>
    %68 = vector.shape_cast %67 : vector<1x128x128xf32> to vector<128x128xf32>
    %cst_27 = arith.constant dense<0.000000e+00> : vector<16x128xf32>
    %69 = tpu.matmul %62, %68, %cst_27 {dimension_numbers = #tpu.dot_dimension_numbers<[1], [0], [0], [1], [0, 0, 1, 1], [], []>} : vector<16x128xf32>, vector<128x128xf32>, vector<16x128xf32> -> vector<16x128xf32>
    %70 = arith.addf %60, %69 : vector<16x128xf32>
    %71 = vector.extract_strided_slice %43 {offsets = [0, 3, 0], sizes = [1, 16, 128], strides = [1, 1, 1]} : vector<1x20x128xf32> to vector<1x16x128xf32>
    %72 = vector.shape_cast %71 : vector<1x16x128xf32> to vector<16x128xf32>
    %c3 = arith.constant 3 : index
    %c0_28 = arith.constant 0 : index
    %c0_29 = arith.constant 0 : index
    %73 = vector.load %arg3[%c3, %c0_28, %c0_29] : memref<9x128x128xf32, #tpu.memory_space<vmem>>, vector<1x128x128xf32>
    %74 = vector.shape_cast %73 : vector<1x128x128xf32> to vector<128x128xf32>
    %cst_30 = arith.constant dense<0.000000e+00> : vector<16x128xf32>
    %75 = tpu.matmul %72, %74, %cst_30 {dimension_numbers = #tpu.dot_dimension_numbers<[1], [0], [0], [1], [0, 0, 1, 1], [], []>} : vector<16x128xf32>, vector<128x128xf32>, vector<16x128xf32> -> vector<16x128xf32>
    %76 = arith.addf %66, %75 : vector<16x128xf32>
    %c7 = arith.constant 7 : index
    %c0_31 = arith.constant 0 : index
    %c0_32 = arith.constant 0 : index
    %77 = vector.load %arg3[%c7, %c0_31, %c0_32] : memref<9x128x128xf32, #tpu.memory_space<vmem>>, vector<1x128x128xf32>
    %78 = vector.shape_cast %77 : vector<1x128x128xf32> to vector<128x128xf32>
    %cst_33 = arith.constant dense<0.000000e+00> : vector<16x128xf32>
    %79 = tpu.matmul %72, %78, %cst_33 {dimension_numbers = #tpu.dot_dimension_numbers<[1], [0], [0], [1], [0, 0, 1, 1], [], []>} : vector<16x128xf32>, vector<128x128xf32>, vector<16x128xf32> -> vector<16x128xf32>
    %80 = arith.addf %70, %79 : vector<16x128xf32>
    %81 = vector.extract_strided_slice %43 {offsets = [0, 4, 0], sizes = [1, 16, 128], strides = [1, 1, 1]} : vector<1x20x128xf32> to vector<1x16x128xf32>
    %82 = vector.shape_cast %81 : vector<1x16x128xf32> to vector<16x128xf32>
    %c4 = arith.constant 4 : index
    %c0_34 = arith.constant 0 : index
    %c0_35 = arith.constant 0 : index
    %83 = vector.load %arg3[%c4, %c0_34, %c0_35] : memref<9x128x128xf32, #tpu.memory_space<vmem>>, vector<1x128x128xf32>
    %84 = vector.shape_cast %83 : vector<1x128x128xf32> to vector<128x128xf32>
    %cst_36 = arith.constant dense<0.000000e+00> : vector<16x128xf32>
    %85 = tpu.matmul %82, %84, %cst_36 {dimension_numbers = #tpu.dot_dimension_numbers<[1], [0], [0], [1], [0, 0, 1, 1], [], []>} : vector<16x128xf32>, vector<128x128xf32>, vector<16x128xf32> -> vector<16x128xf32>
    %86 = arith.addf %76, %85 : vector<16x128xf32>
    %c1_37 = arith.constant 1 : index
    %c0_38 = arith.constant 0 : index
    %87 = vector.load %arg4[%c1_37, %c0_38] : memref<8x128xf32, #tpu.memory_space<vmem>>, vector<1x128xf32>
    %88 = vector.broadcast %87 : vector<1x128xf32> to vector<16x128xf32>
    %89 = arith.addf %80, %88 : vector<16x128xf32>
    %cst_39 = arith.constant 0.000000e+00 : f32
    %90 = vector.broadcast %cst_39 : f32 to vector<16x128xf32>
    %91 = arith.maximumf %89, %90 : vector<16x128xf32>
    %c8 = arith.constant 8 : index
    %c0_40 = arith.constant 0 : index
    %c0_41 = arith.constant 0 : index
    %92 = vector.load %arg3[%c8, %c0_40, %c0_41] : memref<9x128x128xf32, #tpu.memory_space<vmem>>, vector<1x128x128xf32>
    %93 = vector.shape_cast %92 : vector<1x128x128xf32> to vector<128x128xf32>
    %cst_42 = arith.constant dense<0.000000e+00> : vector<16x128xf32>
    %94 = tpu.matmul %91, %93, %cst_42 {dimension_numbers = #tpu.dot_dimension_numbers<[1], [0], [0], [1], [0, 0, 1, 1], [], []>} : vector<16x128xf32>, vector<128x128xf32>, vector<16x128xf32> -> vector<16x128xf32>
    %95 = arith.addf %86, %94 : vector<16x128xf32>
    %c2_43 = arith.constant 2 : index
    %c0_44 = arith.constant 0 : index
    %96 = vector.load %arg4[%c2_43, %c0_44] : memref<8x128xf32, #tpu.memory_space<vmem>>, vector<1x128xf32>
    %97 = vector.broadcast %96 : vector<1x128xf32> to vector<16x128xf32>
    %98 = arith.addf %95, %97 : vector<16x128xf32>
    %cst_45 = arith.constant 0.000000e+00 : f32
    %99 = vector.broadcast %cst_45 : f32 to vector<16x128xf32>
    %100 = arith.maximumf %98, %99 : vector<16x128xf32>
    %101 = vector.shape_cast %100 : vector<16x128xf32> to vector<1x16x128xf32>
    %c0_46 = arith.constant 0 : index
    %c0_47 = arith.constant 0 : index
    %c0_48 = arith.constant 0 : index
    %102 = vector.load %arg5[%c0_46, %c0_47, %c0_48] : memref<1x16x128xf32, #tpu.memory_space<vmem>>, vector<1x16x128xf32>
    tpu.vector_store %arg5[%c0_46, %c0_47, %c0_48], %101 {strides = array<i32>} : memref<1x16x128xf32, #tpu.memory_space<vmem>>, vector<1x16x128xf32>,
    return
  }
  func.func @transform_0(%arg0: i32) -> (i32, i32, i32) {
    %c0_i32 = arith.constant 0 : i32
    %c0_i32_0 = arith.constant 0 : i32
    %c0_i32_1 = arith.constant 0 : i32
    return %arg0, %c0_i32, %c0_i32_0 : i32, i32, i32
  }
  func.func @transform_1(%arg0: i32) -> (i32, i32) {
    %c0_i32 = arith.constant 0 : i32
    %c0_i32_0 = arith.constant 0 : i32
    %c0_i32_1 = arith.constant 0 : i32
    return %c0_i32, %c0_i32_0 : i32, i32
  }
  func.func @transform_2(%arg0: i32) -> (i32, i32, i32) {
    %c0_i32 = arith.constant 0 : i32
    %c0_i32_0 = arith.constant 0 : i32
    %c0_i32_1 = arith.constant 0 : i32
    %c0_i32_2 = arith.constant 0 : i32
    return %c0_i32, %c0_i32_0, %c0_i32_1 : i32, i32, i32
  }
  func.func @transform_3(%arg0: i32) -> (i32, i32) {
    %c0_i32 = arith.constant 0 : i32
    %c0_i32_0 = arith.constant 0 : i32
    %c0_i32_1 = arith.constant 0 : i32
    return %c0_i32, %c0_i32_0 : i32, i32
  }
  func.func @transform_4(%arg0: i32) -> (i32, i32, i32) {
    %c0_i32 = arith.constant 0 : i32
    %c0_i32_0 = arith.constant 0 : i32
    %c0_i32_1 = arith.constant 0 : i32
    return %arg0, %c0_i32, %c0_i32_0 : i32, i32, i32
  }
}

</mosaic_0001>

<bundles_post_ra>
// kernel: inception_block.1
= control target key start
LH: loop header
LB: loop body
LE: loop exit
PB: predicated region body
PF: predicated region fallthrough
CT: control target
= control target key end

     0   :  { %s2321_s15 = smov 0   ;;  %s2879_s0 = inlined_call_operand.vmem [shape: f32[2,16,32], index: 0, kind: input, shape index: {}]   ;;  %s2880_s1 = inlined_call_operand.vmem [shape: f32[32,128], index: 1, kind: input, shape index: {}]   ;;  %s2881_s2 = inlined_call_operand.vmem [shape: f32[9,128,128], index: 2, kind: input, shape index: {}]   ;;  %s2882_s3 = inlined_call_operand.vmem [shape: f32[8,128], index: 3, kind: input, shape index: {}]   ;;  %s2883_s4 = inlined_call_operand.vmem [shape: f32[2,16,128], index: 4, kind: output, shape index: {}]  }
   0x1 LB: > { %s1319_s16 = sadd.s32 4294967295, %s2294_s15   ;;  %p1323_p0 = scmp.ge.s32.totalorder %s2294_s15, 1  ;;  %s2294_s15 = sphi %s2321_s15, %s14_s15  }
   0x2   : > { %p162_p1 = scmp.lt.s32.totalorder %s2294_s15, 3 }
   0x4   : > { %p163_p2 = pnand %p1323_p0, %p162_p1 }
   0x5   : > { %v233_v0 = vld [vmem:[%s2880_s1] sm:$0xff] (!%p163_p2)  ;;  %v234_v1 = vld [vmem:[%s2880_s1 + $0x8] sm:$0xff] (!%p163_p2)  ;;  %v235_v2 = vld [vmem:[%s2880_s1 + $0x10] sm:$0xff] (!%p163_p2)  ;;  %p188_p3 = scmp.lt.s32.totalorder (!%p163_p2), %s1319_s16, 1  ;;  %vm237_vm0 = vcmask (!%p163_p2), 261120   ;;  %vm202_vm1 = vcmask (!%p163_p2), 1040384  }
   0x6   : > { %166 = sbr.rel (%p163_p2) target bundleno = 772 (0x304), region = 36  ;;  %v1968_v3 = vpack.c.bf16 (!%p163_p2), %v234_v1, %v233_v0  ;;  %v236_v4 = vld [vmem:[%s2880_s1 + $0x18] sm:$0xff] (!%p163_p2)  ;;  %v371_v6 = vld [vmem:[%s2881_s2] sm:$0xff] (!%p163_p2)  ;;  %v372_v7 = vld [vmem:[%s2881_s2 + $0x8] sm:$0xff] (!%p163_p2)  ;;  %vm213_vm2 = vcmask (!%p163_p2), 1046528   ;;  %vm223_vm3 = vcmask (!%p163_p2), 1045504  }
   0x7   : > { %v1972_v5 = vpack.c.bf16 (!%p163_p2), %v236_v4, %v235_v2  ;;  %v1335_v8 = vld [vmem:[%s2881_s2 + $0x80] sm:$0xff] (!%p163_p2)  ;;  %v1336_v9 = vld [vmem:[%s2881_s2 + $0x88] sm:$0xff] (!%p163_p2)  ;;  %v1337_v11 = vld [vmem:[%s2881_s2 + $0x90] sm:$0xff] (!%p163_p2)  ;;  %v1976_v13 = vpack.c.bf16 (!%p163_p2), %v372_v7, %v371_v6  ;;  %vm362_vm8 = vcmask (!%p163_p2), 1041408   ;;  %vm869_vm13 = vcmask (!%p163_p2), 1044480  }
   0x8   : > { %1969 = vmatprep.subr.bf16.mxu0 (!%p163_p2), %v1968_v3  ;;  %v2008_v10 = vpack.c.bf16 (!%p163_p2), %v1336_v9, %v1335_v8  ;;  %v1338_v12 = vld [vmem:[%s2881_s2 + $0x98] sm:$0xff] (!%p163_p2)  ;;  %v373_v14 = vld [vmem:[%s2881_s2 + $0x10] sm:$0xff] (!%p163_p2)  ;;  %v1339_v16 = vld [vmem:[%s2881_s2 + $0xa0] sm:$0xff] (!%p163_p2)  ;;  %vm1065_vm14 = vcmask (!%p163_p2), 1043456  }
   0x9   : > { %1971 = vmatpush3.bf16.msra.mxu0 (!%p163_p2), %v1968_v3  ;;  %v2012_v15 = vpack.c.bf16 (!%p163_p2), %v1338_v12, %v1337_v11  ;;  %v1340_v17 = vld [vmem:[%s2881_s2 + $0xa8] sm:$0xff] (!%p163_p2)  ;;  %v374_v20 = vld [vmem:[%s2881_s2 + $0x18] sm:$0xff] (!%p163_p2)  ;;  %v375_v23 = vld [vmem:[%s2881_s2 + $0x20] sm:$0xff] (!%p163_p2) }
   0xa   : > { %1973 = vmatprep.subr.bf16.mxu0 (!%p163_p2), %v1972_v5  ;;  %2009 = vmatprep.subr.bf16.mxu1 (!%p163_p2), %v2008_v10  ;;  %v376_v24 = vld [vmem:[%s2881_s2 + $0x28] sm:$0xff] (!%p163_p2)  ;;  %v2016_v25 = vpack.c.bf16 (!%p163_p2), %v1340_v17, %v1339_v16  ;;  %v1980_v29 = vpack.c.bf16 (!%p163_p2), %v374_v20, %v373_v14  ;;  %v1341_v30 = vld [vmem:[%s2881_s2 + $0xb0] sm:$0xff] (!%p163_p2)  ;;  %v1342_v31 = vld [vmem:[%s2881_s2 + $0xb8] sm:$0xff] (!%p163_p2)  ;;  %v333_v17 = vlaneseq (!%p163_p2) }
   0xb   : > { %2011 = vmatpush3.bf16.msra.mxu1 (!%p163_p2), %v2008_v10  ;;  %v1984_v38 = vpack.c.bf16 (!%p163_p2), %v376_v24, %v375_v23  ;;  %v2020_v41 = vpack.c.bf16 (!%p163_p2), %v1342_v31, %v1341_v30  ;;  %v1343_v46 = vld [vmem:[%s2881_s2 + $0xc0] sm:$0xff] (!%p163_p2)  ;;  %v1344_v47 = vld [vmem:[%s2881_s2 + $0xc8] sm:$0xff] (!%p163_p2)  ;;  %v377_v48 = vld [vmem:[%s2881_s2 + $0x30] sm:$0xff] (!%p163_p2) }
   0xc   : > { %2013 = vmatprep.subr.bf16.mxu1 (!%p163_p2), %v2012_v15  ;;  %v378_v49 = vld [vmem:[%s2881_s2 + $0x38] sm:$0xff] (!%p163_p2)  ;;  %v2024_v52 = vpack.c.bf16 (!%p163_p2), %v1344_v47, %v1343_v46  ;;  %v379_v54 = vld [vmem:[%s2881_s2 + $0x40] sm:$0xff] (!%p163_p2)  ;;  %v380_v55 = vld [vmem:[%s2881_s2 + $0x48] sm:$0xff] (!%p163_p2) }
   0xd   : > { %s2889_s16 = smov (!%p188_p3, %s1319_s16), 1  ;;  %1975 = vmatpush3.bf16.msra.mxu0 %v1972_v5  ;;  %v1988_v53 = vpack.c.bf16 %v378_v49, %v377_v48  ;;  %v1992_v56 = vpack.c.bf16 %v380_v55, %v379_v54  ;;  %v381_v57 = vld [vmem:[%s2881_s2 + $0x50] sm:$0xff]  ;;  %v382_v58 = vld [vmem:[%s2881_s2 + $0x58] sm:$0xff]  ;;  %v383_v60 = vld [vmem:[%s2881_s2 + $0x60] sm:$0xff] }
   0xe   : > { %s1467_s7 = sshll.u32 %s2889_s16, 4  ;;  %1977 = vmatprep.subr.bf16.mxu0 %v1976_v13  ;;  %v1996_v59 = vpack.c.bf16 %v382_v58, %v381_v57  ;;  %v384_v61 = vld [vmem:[%s2881_s2 + $0x68] sm:$0xff]  ;;  %v1345_v62 = vld [vmem:[%s2881_s2 + $0xd0] sm:$0xff]  ;;  %v1346_v0 = vld [vmem:[%s2881_s2 + $0xd8] sm:$0xff] }
   0xf   : > { %s192_s14 = scalar_lea.vmem %s2879_s0, %s1467_s7  ;;  %2015 = vmatpush3.bf16.msra.mxu1 %v2012_v15  ;;  %v2000_v63 = vpack.c.bf16 %v384_v61, %v383_v60  ;;  %v2028_v1 = vpack.c.bf16 %v1346_v0, %v1345_v62  ;;  %v385_v2 = vld [vmem:[%s2881_s2 + $0x70] sm:$0xff]  ;;  %v386_v3 = vld [vmem:[%s2881_s2 + $0x78] sm:$0xff]  ;;  %v1347_v4 = vld [vmem:[%s2881_s2 + $0xe0] sm:$0xff]  ;;  %s197_s25 = scalar_lea.vmem %s2883_s4, %s1467_s7 }
  0x10   : > { %v198_v18 = vld [vmem:[%s192_s14] sm:$0xff]  ;;  %v199_v19 = vld [vmem:[%s192_s14 + $0x8] sm:$0xff]  ;;  %2017 = vmatprep.subr.bf16.mxu1 %v2016_v25  ;;  %v2004_v5 = vpack.c.bf16 %v386_v3, %v385_v2  ;;  %v1349_v8 = vld [vmem:[%s2881_s2 + $0xf0] sm:$0xff] }
  0x11   : > { %v203_v21 = vrot.slane %v198_v18, 7  ;;  %v204_v22 = vrot.slane %v199_v19, 7  ;;  %1647 = vmatprep.mubr.msk.f32.mxu0 %vm237_vm0, %v198_v18  ;;  %v1348_v6 = vld [vmem:[%s2881_s2 + $0xe8] sm:$0xff]  ;;  %v1350_v9 = vld [vmem:[%s2881_s2 + $0xf8] sm:$0xff]  ;;  %v1383_v10 = vld [vmem:[%s2881_s2 + $0x300] sm:$0xff]  ;;  %v334_v18 = vand.u32 127, %v333_v17 }
  0x12   : > { %1648 = vmatmul.mubr.msk.f32.vlgmr.msra.gmra.mrb[0].mxu0 %vm237_vm0, %v199_v19  ;;  %v2032_v7 = vpack.c.bf16 %v1348_v6, %v1347_v4  ;;  %v2036_v11 = vpack.c.bf16 %v1350_v9, %v1349_v8  ;;  %v1384_v12 = vld [vmem:[%s2881_s2 + $0x308] sm:$0xff]  ;;  %v1367_v14 = vld [vmem:[%s2881_s2 + $0x100] sm:$0xff]  ;;  %v1385_v24 = vld [vmem:[%s2881_s2 + $0x310] sm:$0xff] }
  0x13   : > { %v205_v26 = vsel %vm202_vm1, %v203_v21, %v204_v22  ;;  %v209_v27 = vsel %vm202_vm1, -inf, %v203_v21  ;;  %v210_v28 = vsel %vm202_vm1, %v204_v22, -inf  ;;  %1979 = vmatpush3.bf16.msra.mxu0 %v1976_v13  ;;  %2019 = vmatpush3.bf16.msra.mxu1 %v2016_v25  ;;  %v2072_v13 = vpack.c.bf16 %v1384_v12, %v1383_v10  ;;  %v1368_v15 = vld [vmem:[%s2881_s2 + $0x108] sm:$0xff]  ;;  %v1332_v19 = vld [vmem:[%s2882_s3] ss:$0 sm:$0xff]  ;;  %v1386_v25 = vld [vmem:[%s2881_s2 + $0x318] sm:$0xff] }
  0x14   : > { %v214_v32 = vrot.slane %v209_v27, 1  ;;  %v215_v33 = vrot.slane %v205_v26, 1  ;;  %v217_v34 = vrot.slane %v210_v28, 1  ;;  %v224_v35 = vrot.slane %v209_v27, 2  ;;  %1981 = vmatprep.subr.bf16.mxu0 %v1980_v29  ;;  %2021 = vmatprep.subr.bf16.mxu1 %v2020_v41  ;;  %v1387_v31 = vld [vmem:[%s2881_s2 + $0x320] sm:$0xff]  ;;  %vm1333_vm10 = vmneg %vm362_vm8  ;;  %v1372_v61 = vld [vmem:[%s2881_s2 + $0x128] sm:$0xff] }
  0x15   : > { %v225_v36 = vrot.slane %v205_v26, 2  ;;  %v227_v37 = vrot.slane %v210_v28, 2  ;;  %v2468_v16 = vpack.c.bf16 %v1368_v15, %v1367_v14  ;;  %vm336_vm4 = vcmp.ge.s32.totalorder %v334_v18, 72  ;;  %v1370_v28 = vld [vmem:[%s2881_s2 + $0x118] sm:$0xff]  ;;  %v1389_v62 = vld [vmem:[%s2881_s2 + $0x330] sm:$0xff]  ;;  %v1391_v12 = vld [vmem:[%s2881_s2 + $0x340] sm:$0xff] }
  0x16   : > { %v216_v39 = vsel %vm213_vm2, %v214_v32, %v215_v33  ;;  %v218_v40 = vsel %vm213_vm2, %v215_v33, %v217_v34  ;;  %vm337_vm5 = vcmp.lt.s32.totalorder %v334_v18, 96  ;;  %vm335_vm6 = vcmp.lt.s32.totalorder %v334_v18, 24  ;;  %v1388_v32 = vld [vmem:[%s2881_s2 + $0x328] sm:$0xff]  ;;  %v1373_v10 = vld [vmem:[%s2881_s2 + $0x130] sm:$0xff] }
  0x17   : > { %v221_v42 = vmax.f32 %v209_v27, %v216_v39  ;;  %v222_v43 = vmax.f32 %v205_v26, %v218_v40  ;;  %v226_v44 = vsel %vm223_vm3, %v224_v35, %v225_v36  ;;  %v228_v45 = vsel %vm223_vm3, %v225_v36, %v227_v37  ;;  %1983 = vmatpush3.bf16.msra.mxu0 %v1980_v29  ;;  %vm338_vm7 = vmand %vm336_vm4, %vm337_vm5  ;;  %v1369_v27 = vld [vmem:[%s2881_s2 + $0x110] sm:$0xff]  ;;  %v1376_v17 = vld [vmem:[%s2881_s2 + $0x148] sm:$0xff] }
  0x18   : > { %1985 = vmatprep.subr.bf16.mxu0 %v1984_v38  ;;  %2023 = vmatpush3.bf16.msra.mxu1 %v2020_v41  ;;  %vm2489_vm9 = vmor %vm335_vm6, %vm338_vm7  ;;  %v2076_v34 = vpack.c.bf16 %v1386_v25, %v1385_v24  ;;  %vm340_vm11 = vcmp.ge.s32.totalorder %v334_v18, 96  ;;  %vm341_vm12 = vcmp.lt.s32.totalorder %v334_v18, 120  ;;  %v2044_v36 = vpack.c.bf16 %v1370_v28, %v1369_v27  ;;  %v1393_v18 = vld [vmem:[%s2881_s2 + $0x350] sm:$0xff]  ;;  %v1395_v24 = vld [vmem:[%s2881_s2 + $0x360] sm:$0xff] }
  0x19   : > { %v231_v50 = vmax.f32 %v221_v42, %v226_v44  ;;  %v232_v51 = vmax.f32 %v222_v43, %v228_v45  ;;  %2025 = vmatprep.subr.bf16.mxu1 %v2024_v52  ;;  %v2080_v41 = vpack.c.bf16 %v1388_v32, %v1387_v31  ;;  %vm2510_vm15 = vmand %vm340_vm11, %vm341_vm12  ;;  %v1396_v25 = vld [vmem:[%s2881_s2 + $0x368] sm:$0xff]  ;;  %v1379_v28 = vld [vmem:[%s2881_s2 + $0x160] sm:$0xff] }
  0x1a   : > { %v2096_v27 = vpack.c.bf16 %v1396_v25, %v1395_v24  ;;  %v1380_v29 = vld [vmem:[%s2881_s2 + $0x168] sm:$0xff]  ;;  %v1398_v31 = vld [vmem:[%s2881_s2 + $0x378] sm:$0xff]  ;;  %v1413_v25 = vld [vmem:[%s2881_s2 + $0x1f0] sm:$0xff] }
  0x1b   : > { %1650 = vmatprep.mubr.msk.f32.mxu0 %vm237_vm0, %v231_v50  ;;  %1987 = vmatpush3.bf16.msra.mxu0 %v1984_v38  ;;  %v2064_v32 = vpack.c.bf16 %v1380_v29, %v1379_v28  ;;  %v1404_v55 = vld [vmem:[%s2881_s2 + $0x1a8] sm:$0xff] }
  0x1c   : > { %1651 = vmatmul.mubr.msk.f32.gmra.mrb[2].mxu0 %vm237_vm0, %v232_v51  ;;  %1989 = vmatprep.subr.bf16.mxu0 %v1988_v53  ;;  %v1416_v28 = vld [vmem:[%s2881_s2 + $0x388] sm:$0xff] }
  0x1d   : > { %2027 = vmatpush3.bf16.msra.mxu1 %v2024_v52 }
  0x1e   : > { %2029 = vmatprep.subr.bf16.mxu1 %v2028_v1 }
  0x1f   : > { %1991 = vmatpush3.bf16.msra.mxu0 %v1988_v53 }
  0x20   : > { %1993 = vmatprep.subr.bf16.mxu0 %v1992_v56 }
  0x21   : > { %2031 = vmatpush3.bf16.msra.mxu1 %v2028_v1 }
  0x22   : > { %2033 = vmatprep.subr.bf16.mxu1 %v2032_v7 }
  0x23   : > { %1995 = vmatpush3.bf16.msra.mxu0 %v1992_v56 }
  0x24   : > { %1997 = vmatprep.subr.bf16.mxu0 %v1996_v59 }
  0x25   : > { %2035 = vmatpush3.bf16.msra.mxu1 %v2032_v7 }
  0x26   : > { %2037 = vmatprep.subr.bf16.mxu1 %v2036_v11 }
  0x27   : > { %1999 = vmatpush3.bf16.msra.mxu0 %v1996_v59  ;;  %v1371_v59 = vld [vmem:[%s2881_s2 + $0x120] sm:$0xff] }
  0x28   : > { %2001 = vmatprep.subr.bf16.mxu0 %v2000_v63  ;;  %v2048_v8 = vpack.c.bf16 %v1372_v61, %v1371_v59  ;;  %v1359_v59 = vld [vmem:[%s2881_s2 + $0x2c0] sm:$0xff]  ;;  %v1360_v61 = vld [vmem:[%s2881_s2 + $0x2c8] sm:$0xff] }
  0x29   : > { %2039 = vmatpush3.bf16.msra.mxu1 %v2036_v11  ;;  %v1374_v11 = vld [vmem:[%s2881_s2 + $0x138] sm:$0xff] }
  0x2a   : > { %2041 = vmatprep.subr.bf16.mxu1 %v2468_v16  ;;  %v2052_v14 = vpack.c.bf16 %v1374_v11, %v1373_v10  ;;  %v1408_v10 = vld [vmem:[%s2881_s2 + $0x1c8] sm:$0xff] }
  0x2b   : > { %2003 = vmatpush3.bf16.msra.mxu0 %v2000_v63  ;;  %v1390_v63 = vld [vmem:[%s2881_s2 + $0x338] sm:$0xff] }
  0x2c   : > { %2005 = vmatprep.subr.bf16.mxu0 %v2004_v5  ;;  %v2084_v9 = vpack.c.bf16 %v1390_v63, %v1389_v62  ;;  %v1406_v62 = vld [vmem:[%s2881_s2 + $0x1b8] sm:$0xff]  ;;  %v2120_v63 = vpack.c.bf16 %v1360_v61, %v1359_v59  ;;  %v1427_v59 = vld [vmem:[%s2881_s2 + $0x3e0] sm:$0xff]  ;;  %v1428_v61 = vld [vmem:[%s2881_s2 + $0x3e8] sm:$0xff] }
  0x2f   : > { %2007 = vmatpush3.bf16.msra.mxu0 %v2004_v5 }
  0x30   : > { %2073 = vmatprep.subr.bf16.mxu0 %v2072_v13 }
  0xe5   : > { %v2474_v20 = vpop.f32.mrb[0].mxu0 }
  0xe6   : > { %v357_v21 = vadd.f32 %v2474_v20, %v1332_v19  ;;  %v314_v22 = vpop.f32.mrb[1].mxu0  ;;  %v346_v37 = vsel %vm2489_vm9, %v2474_v20, 0.0 }
  0xe7   : > { %v356_v23 = vadd.f32 %v1332_v19, %v314_v22  ;;  %v345_v39 = vsel %vm2489_vm9, %v314_v22, 0.0  ;;  %v1394_v19 = vld [vmem:[%s2881_s2 + $0x358] sm:$0xff]  ;;  %v1377_v22 = vld [vmem:[%s2881_s2 + $0x150] sm:$0xff] }
  0xe8   : > { %v359_v26 = vmax.f32 %v357_v21, 0.0  ;;  %v2092_v21 = vpack.c.bf16 %v1394_v19, %v1393_v18  ;;  %v1365_v19 = vld [vmem:[%s2881_s2 + $0x2f0] sm:$0xff] }
  0xe9   : > { %v358_v30 = vmax.f32 %v356_v23, 0.0  ;;  %v1378_v23 = vld [vmem:[%s2881_s2 + $0x158] sm:$0xff] }
  0xea   : > { %v364_v33 = vrot.slane %v359_v26, 6  ;;  %v2060_v26 = vpack.c.bf16 %v1378_v23, %v1377_v22  ;;  %v1412_v22 = vld [vmem:[%s2881_s2 + $0x1e8] sm:$0xff] }
  0xeb   : > { %v363_v35 = vrot.slane %v358_v30, 6  ;;  %v1397_v30 = vld [vmem:[%s2881_s2 + $0x370] sm:$0xff] }
  0xec   : > { %v370_v38 = vsel %vm362_vm8, %v364_v33, 0.0 }
  0xed   : > { %v369_v42 = vsel %vm362_vm8, 0.0, %v363_v35  ;;  %1685 = vmatprep.mubr.msk.f32.mxu0 %vm1333_vm10, %v363_v35  ;;  %v365_v44 = vsel %vm362_vm8, %v363_v35, %v364_v33  ;;  %v486_v45 = vrot.slane %v370_v38, 1  ;;  %v604_v46 = vrot.slane %v370_v38, 2  ;;  %v1382_v35 = vld [vmem:[%s2881_s2 + $0x178] sm:$0xff] }
  0xee   : > { %1686 = vmatmul.mubr.f32.vlgmr.msra.gmra.mrb[4].mxu0 %v365_v44  ;;  %v483_v47 = vrot.slane %v369_v42, 1  ;;  %v484_v48 = vrot.slane %v365_v44, 1  ;;  %v601_v49 = vrot.slane %v369_v42, 2  ;;  %v602_v50 = vrot.slane %v365_v44, 2 }
  0xef   : > { %v1652_v40 = vpop.f32.mrb[2].mxu0  ;;  %2075 = vmatpush3.bf16.msra.mxu0 %v2072_v13  ;;  %v870_v51 = vrot.slane %v369_v42, 3  ;;  %v871_v52 = vrot.slane %v365_v44, 3  ;;  %v873_v53 = vrot.slane %v370_v38, 3  ;;  %v1066_v54 = vrot.slane %v369_v42, 4  ;;  %v1392_v13 = vld [vmem:[%s2881_s2 + $0x348] sm:$0xff] }
  0xf0   : > { %v324_v43 = vpop.f32.mrb[3].mxu0  ;;  %v2515_v56 = vsel %vm213_vm2, %v483_v47, %v484_v48  ;;  %2077 = vmatprep.subr.bf16.mxu0 %v2076_v34  ;;  %v603_v57 = vsel %vm223_vm3, %v601_v49, %v602_v50  ;;  %v2519_v58 = vsel %vm213_vm2, %v484_v48, %v486_v45  ;;  %v2525_v60 = vsel %vm223_vm3, %v602_v50, %v604_v46  ;;  %v1399_v42 = vld [vmem:[%s2881_s2 + $0x180] sm:$0xff]  ;;  %v1356_v47 = vld [vmem:[%s2881_s2 + $0x2a8] sm:$0xff]  ;;  %v1401_v48 = vld [vmem:[%s2881_s2 + $0x190] sm:$0xff] }
  0xf1   : > { %1720 = vmatprep.mubr.f32.mxu1 %v2515_v56  ;;  %1790 = vmatprep.mubr.f32.mxu0 %v603_v57  ;;  %v2538_v0 = vsel %vm869_vm13, %v870_v51, %v871_v52  ;;  %v2541_v1 = vsel %vm869_vm13, %v871_v52, %v873_v53  ;;  %v1067_v2 = vrot.slane %v365_v44, 4  ;;  %v1069_v3 = vrot.slane %v370_v38, 4  ;;  %v1355_v46 = vld [vmem:[%s2881_s2 + $0x2a0] sm:$0xff]  ;;  %v1402_v49 = vld [vmem:[%s2881_s2 + $0x198] sm:$0xff]  ;;  %v1357_v51 = vld [vmem:[%s2881_s2 + $0x2b0] sm:$0xff] }
  0xf2   : > { %1721 = vmatmul.mubr.f32.vlgmr.msra.gmra.mrb[0].mxu1 %v2519_v58  ;;  %v2546_v4 = vsel %vm2510_vm15, %v1652_v40, %v346_v37  ;;  %v2550_v5 = vsel %vm2510_vm15, %v324_v43, %v345_v39  ;;  %v2088_v15 = vpack.c.bf16 %v1392_v13, %v1391_v12  ;;  %v2100_v33 = vpack.c.bf16 %v1398_v31, %v1397_v30  ;;  %v1352_v37 = vld [vmem:[%s2881_s2 + $0x288] sm:$0xff]  ;;  %v1353_v40 = vld [vmem:[%s2881_s2 + $0x290] sm:$0xff]  ;;  %v1358_v53 = vld [vmem:[%s2881_s2 + $0x2b8] sm:$0xff] }
  0xf3   : > { %2043 = vmatpush3.bf16.msra.mxu1 %v2468_v16  ;;  %2079 = vmatpush3.bf16.msra.mxu0 %v2076_v34  ;;  %v2554_v6 = vsel %vm1065_vm14, %v1066_v54, %v1067_v2  ;;  %v2557_v7 = vsel %vm1065_vm14, %v1067_v2, %v1069_v3  ;;  %v1375_v16 = vld [vmem:[%s2881_s2 + $0x140] sm:$0xff]  ;;  %v1381_v34 = vld [vmem:[%s2881_s2 + $0x170] sm:$0xff]  ;;  %v1400_v43 = vld [vmem:[%s2881_s2 + $0x188] sm:$0xff]  ;;  %v2112_v50 = vpack.c.bf16 %v1356_v47, %v1355_v46 }
  0xf4   : > { %1755 = vmatprep.mubr.f32.mxu1 %v603_v57  ;;  %2045 = vmatprep.subr.bf16.mxu1 %v2044_v36  ;;  %v2056_v20 = vpack.c.bf16 %v1376_v17, %v1375_v16  ;;  %v2068_v38 = vpack.c.bf16 %v1382_v35, %v1381_v34  ;;  %v2136_v45 = vpack.c.bf16 %v1400_v43, %v1399_v42  ;;  %v1403_v54 = vld [vmem:[%s2881_s2 + $0x1a0] sm:$0xff]  ;;  %v1361_v3 = vld [vmem:[%s2881_s2 + $0x2d0] sm:$0xff]  ;;  %v1410_v16 = vld [vmem:[%s2881_s2 + $0x1d8] sm:$0xff] }
  0xf5   : > { %2081 = vmatprep.subr.bf16.mxu0 %v2080_v41  ;;  %v2140_v52 = vpack.c.bf16 %v1402_v49, %v1401_v48  ;;  %v2144_v57 = vpack.c.bf16 %v1404_v55, %v1403_v54  ;;  %v1363_v13 = vld [vmem:[%s2881_s2 + $0x2e0] sm:$0xff]  ;;  %v1417_v31 = vld [vmem:[%s2881_s2 + $0x390] sm:$0xff]  ;;  %v1432_v34 = vld [vmem:[%s2881_s2 + $0x208] sm:$0xff] }
  0xf6   : > { %v1421_v42 = vld [vmem:[%s2881_s2 + $0x3b0] sm:$0xff]  ;;  %v1422_v43 = vld [vmem:[%s2881_s2 + $0x3b8] sm:$0xff]  ;;  %v1423_v47 = vld [vmem:[%s2881_s2 + $0x3c0] sm:$0xff] }
  0xf7   : > { %2047 = vmatpush3.bf16.msra.mxu1 %v2044_v36  ;;  %2083 = vmatpush3.bf16.msra.mxu0 %v2080_v41  ;;  %v1351_v36 = vld [vmem:[%s2881_s2 + $0x280] sm:$0xff]  ;;  %v1354_v41 = vld [vmem:[%s2881_s2 + $0x298] sm:$0xff]  ;;  %v1424_v48 = vld [vmem:[%s2881_s2 + $0x3c8] sm:$0xff] }
  0xf8   : > { %2049 = vmatprep.subr.bf16.mxu1 %v2048_v8  ;;  %2085 = vmatprep.subr.bf16.mxu0 %v2084_v9  ;;  %v2104_v39 = vpack.c.bf16 %v1352_v37, %v1351_v36  ;;  %v2108_v44 = vpack.c.bf16 %v1354_v41, %v1353_v40  ;;  %v1419_v37 = vld [vmem:[%s2881_s2 + $0x3a0] sm:$0xff]  ;;  %v1434_v40 = vld [vmem:[%s2881_s2 + $0x218] sm:$0xff]  ;;  %v1437_v49 = vld [vmem:[%s2881_s2 + $0x230] sm:$0xff] }
  0xf9   : > { %v1439_v54 = vld [vmem:[%s2881_s2 + $0x240] sm:$0xff]  ;;  %v1440_v55 = vld [vmem:[%s2881_s2 + $0x248] sm:$0xff] }
  0xfb   : > { %2051 = vmatpush3.bf16.msra.mxu1 %v2048_v8  ;;  %2087 = vmatpush3.bf16.msra.mxu0 %v2084_v9  ;;  %v1362_v8 = vld [vmem:[%s2881_s2 + $0x2d8] sm:$0xff]  ;;  %v1407_v9 = vld [vmem:[%s2881_s2 + $0x1c0] sm:$0xff] }
  0xfc   : > { %2053 = vmatprep.subr.bf16.mxu1 %v2052_v14  ;;  %2089 = vmatprep.subr.bf16.mxu0 %v2088_v15  ;;  %v2124_v11 = vpack.c.bf16 %v1362_v8, %v1361_v3  ;;  %v2152_v12 = vpack.c.bf16 %v1408_v10, %v1407_v9  ;;  %v1429_v3 = vld [vmem:[%s2881_s2 + $0x3f0] sm:$0xff]  ;;  %v1430_v8 = vld [vmem:[%s2881_s2 + $0x3f8] sm:$0xff]  ;;  %v1443_v9 = vld [vmem:[%s2881_s2 + $0x260] sm:$0xff] }
  0xfd   : > { %v1444_v10 = vld [vmem:[%s2881_s2 + $0x268] sm:$0xff] }
  0xff   : > { %2055 = vmatpush3.bf16.msra.mxu1 %v2052_v14  ;;  %2091 = vmatpush3.bf16.msra.mxu0 %v2088_v15  ;;  %v1364_v14 = vld [vmem:[%s2881_s2 + $0x2e8] sm:$0xff]  ;;  %v1409_v15 = vld [vmem:[%s2881_s2 + $0x1d0] sm:$0xff] }
 0x100   : > { %2057 = vmatprep.subr.bf16.mxu1 %v2056_v20  ;;  %2093 = vmatprep.subr.bf16.mxu0 %v2092_v21  ;;  %v2128_v17 = vpack.c.bf16 %v1364_v14, %v1363_v13  ;;  %v2156_v18 = vpack.c.bf16 %v1410_v16, %v1409_v15  ;;  %v1445_v13 = vld [vmem:[%s2881_s2 + $0x270] sm:$0xff]  ;;  %v1446_v14 = vld [vmem:[%s2881_s2 + $0x278] sm:$0xff]  ;;  %v1448_v16 = vld [vmem:[%s2881_s2 + $0x400] sm:$0xff] }
 0x101   : > { %v2228_v15 = vpack.c.bf16 %v1446_v14, %v1445_v13 }
 0x103   : > { %2059 = vmatpush3.bf16.msra.mxu1 %v2056_v20  ;;  %2095 = vmatpush3.bf16.msra.mxu0 %v2092_v21  ;;  %v1366_v20 = vld [vmem:[%s2881_s2 + $0x2f8] sm:$0xff]  ;;  %v1411_v21 = vld [vmem:[%s2881_s2 + $0x1e0] sm:$0xff] }
 0x104   : > { %2061 = vmatprep.subr.bf16.mxu1 %v2060_v26  ;;  %2097 = vmatprep.subr.bf16.mxu0 %v2096_v27  ;;  %v2132_v23 = vpack.c.bf16 %v1366_v20, %v1365_v19  ;;  %v2160_v24 = vpack.c.bf16 %v1412_v22, %v1411_v21  ;;  %v1450_v19 = vld [vmem:[%s2881_s2 + $0x410] sm:$0xff]  ;;  %v1451_v20 = vld [vmem:[%s2881_s2 + $0x418] sm:$0xff]  ;;  %v1452_v22 = vld [vmem:[%s2881_s2 + $0x420] sm:$0xff] }
 0x105   : > { %v2236_v21 = vpack.c.bf16 %v1451_v20, %v1450_v19 }
 0x107   : > { %2063 = vmatpush3.bf16.msra.mxu1 %v2060_v26  ;;  %2099 = vmatpush3.bf16.msra.mxu0 %v2096_v27  ;;  %v1414_v26 = vld [vmem:[%s2881_s2 + $0x1f8] sm:$0xff]  ;;  %v1415_v27 = vld [vmem:[%s2881_s2 + $0x380] sm:$0xff] }
 0x108   : > { %2065 = vmatprep.subr.bf16.mxu1 %v2064_v32  ;;  %2101 = vmatprep.subr.bf16.mxu0 %v2100_v33  ;;  %v2164_v29 = vpack.c.bf16 %v1414_v26, %v1413_v25  ;;  %v2168_v30 = vpack.c.bf16 %v1416_v28, %v1415_v27  ;;  %v1455_v25 = vld [vmem:[%s2881_s2 + $0x438] sm:$0xff]  ;;  %v1456_v27 = vld [vmem:[%s2881_s2 + $0x440] sm:$0xff] }
 0x10b   : > { %2067 = vmatpush3.bf16.msra.mxu1 %v2064_v32  ;;  %2103 = vmatpush3.bf16.msra.mxu0 %v2100_v33  ;;  %v1418_v32 = vld [vmem:[%s2881_s2 + $0x398] sm:$0xff]  ;;  %v1431_v33 = vld [vmem:[%s2881_s2 + $0x200] sm:$0xff] }
 0x10c   : > { %2069 = vmatprep.subr.bf16.mxu1 %v2068_v38  ;;  %2105 = vmatprep.subr.bf16.mxu0 %v2104_v39  ;;  %v2172_v35 = vpack.c.bf16 %v1418_v32, %v1417_v31  ;;  %v2200_v36 = vpack.c.bf16 %v1432_v34, %v1431_v33  ;;  %v1460_v32 = vld [vmem:[%s2881_s2 + $0x460] sm:$0xff]  ;;  %v1461_v33 = vld [vmem:[%s2881_s2 + $0x468] sm:$0xff] }
 0x10d   : > { %v2256_v34 = vpack.c.bf16 %v1461_v33, %v1460_v32 }
 0x10e   : > { %1791 = vmatmul.mubr.f32.vlgmr.msra.gmra.mrb[6].mxu0 %v2525_v60 }
 0x10f   : > { %2071 = vmatpush3.bf16.msra.mxu1 %v2068_v38  ;;  %2107 = vmatpush3.bf16.msra.mxu0 %v2104_v39  ;;  %v1420_v38 = vld [vmem:[%s2881_s2 + $0x3a8] sm:$0xff]  ;;  %v1433_v39 = vld [vmem:[%s2881_s2 + $0x210] sm:$0xff] }
 0x110   : > { %1825 = vmatprep.mubr.f32.mxu0 %v2515_v56  ;;  %2109 = vmatprep.subr.bf16.mxu0 %v2108_v44  ;;  %v2116_v56 = vpack.c.bf16 %v1358_v53, %v1357_v51  ;;  %v2176_v41 = vpack.c.bf16 %v1420_v38, %v1419_v37  ;;  %v1426_v53 = vld [vmem:[%s2881_s2 + $0x3d8] sm:$0xff] }
 0x111   : > { %2137 = vmatprep.subr.bf16.mxu1 %v2136_v45 }
 0x112   : > { %1756 = vmatmul.mubr.f32.vlgmr.msra.gmra.mrb[0].mxu1 %v2525_v60  ;;  %v1405_v60 = vld [vmem:[%s2881_s2 + $0x1b0] sm:$0xff] }
 0x113   : > { %2111 = vmatpush3.bf16.msra.mxu0 %v2108_v44  ;;  %2139 = vmatpush3.bf16.msra.mxu1 %v2136_v45  ;;  %v2148_v2 = vpack.c.bf16 %v1406_v62, %v1405_v60  ;;  %v1435_v44 = vld [vmem:[%s2881_s2 + $0x220] sm:$0xff]  ;;  %v2180_v45 = vpack.c.bf16 %v1422_v43, %v1421_v42  ;;  %v1441_v60 = vld [vmem:[%s2881_s2 + $0x250] sm:$0xff]  ;;  %v1442_v62 = vld [vmem:[%s2881_s2 + $0x258] sm:$0xff] }
 0x114   : > { %1860 = vmatprep.mubr.f32.mxu1 %v2538_v0  ;;  %2113 = vmatprep.subr.bf16.mxu0 %v2112_v50  ;;  %v1447_v42 = vld [vmem:[%s2882_s3 + $0x1] ss:$0 sm:$0xff] }
 0x115   : > { %2141 = vmatprep.subr.bf16.mxu1 %v2140_v52 }
 0x117   : > { %2115 = vmatpush3.bf16.msra.mxu0 %v2112_v50  ;;  %2143 = vmatpush3.bf16.msra.mxu1 %v2140_v52  ;;  %v2184_v50 = vpack.c.bf16 %v1424_v48, %v1423_v47  ;;  %v1425_v52 = vld [vmem:[%s2881_s2 + $0x3d0] sm:$0xff] }
 0x118   : > { %2117 = vmatprep.subr.bf16.mxu0 %v2116_v56  ;;  %2145 = vmatprep.subr.bf16.mxu1 %v2144_v57 }
 0x11b   : > { %2119 = vmatpush3.bf16.msra.mxu0 %v2116_v56  ;;  %2147 = vmatpush3.bf16.msra.mxu1 %v2144_v57  ;;  %v2188_v56 = vpack.c.bf16 %v1426_v53, %v1425_v52  ;;  %v2216_v57 = vpack.c.bf16 %v1440_v55, %v1439_v54 }
 0x11c   : > { %2121 = vmatprep.subr.bf16.mxu0 %v2120_v63  ;;  %2149 = vmatprep.subr.bf16.mxu1 %v2148_v2 }
 0x11f   : > { %2123 = vmatpush3.bf16.msra.mxu0 %v2120_v63  ;;  %2151 = vmatpush3.bf16.msra.mxu1 %v2148_v2  ;;  %v2192_v63 = vpack.c.bf16 %v1428_v61, %v1427_v59  ;;  %v2220_v2 = vpack.c.bf16 %v1442_v62, %v1441_v60 }
 0x120   : > { %2125 = vmatprep.subr.bf16.mxu0 %v2124_v11  ;;  %2153 = vmatprep.subr.bf16.mxu1 %v2152_v12 }
 0x123   : > { %2127 = vmatpush3.bf16.msra.mxu0 %v2124_v11  ;;  %2155 = vmatpush3.bf16.msra.mxu1 %v2152_v12  ;;  %v2196_v11 = vpack.c.bf16 %v1430_v8, %v1429_v3  ;;  %v2224_v12 = vpack.c.bf16 %v1444_v10, %v1443_v9 }
 0x124   : > { %2129 = vmatprep.subr.bf16.mxu0 %v2128_v17  ;;  %2157 = vmatprep.subr.bf16.mxu1 %v2156_v18 }
 0x127   : > { %2131 = vmatpush3.bf16.msra.mxu0 %v2128_v17  ;;  %2159 = vmatpush3.bf16.msra.mxu1 %v2156_v18  ;;  %v1449_v17 = vld [vmem:[%s2881_s2 + $0x408] sm:$0xff] }
 0x128   : > { %2133 = vmatprep.subr.bf16.mxu0 %v2132_v23  ;;  %2161 = vmatprep.subr.bf16.mxu1 %v2160_v24  ;;  %v2232_v18 = vpack.c.bf16 %v1449_v17, %v1448_v16 }
 0x12b   : > { %2135 = vmatpush3.bf16.msra.mxu0 %v2132_v23  ;;  %2163 = vmatpush3.bf16.msra.mxu1 %v2160_v24  ;;  %v1453_v23 = vld [vmem:[%s2881_s2 + $0x428] sm:$0xff] }
 0x12c   : > { %2165 = vmatprep.subr.bf16.mxu1 %v2164_v29  ;;  %2169 = vmatprep.subr.bf16.mxu0 %v2168_v30  ;;  %v2240_v24 = vpack.c.bf16 %v1453_v23, %v1452_v22 }
 0x12e   : > { %1826 = vmatmul.mubr.f32.vlgmr.msra.gmra.mrb[6].mxu0 %v2519_v58  ;;  %v2204_v58 = vpack.c.bf16 %v1434_v40, %v1433_v39 }
 0x12f   : > { %2167 = vmatpush3.bf16.msra.mxu1 %v2164_v29  ;;  %2171 = vmatpush3.bf16.msra.mxu0 %v2168_v30  ;;  %v1458_v29 = vld [vmem:[%s2881_s2 + $0x450] sm:$0xff]  ;;  %v1459_v30 = vld [vmem:[%s2881_s2 + $0x458] sm:$0xff] }
 0x130   : > { %1895 = vmatprep.mubr.f32.mxu0 %v2538_v0  ;;  %2173 = vmatprep.subr.bf16.mxu0 %v2172_v35  ;;  %v1436_v0 = vld [vmem:[%s2881_s2 + $0x228] sm:$0xff]  ;;  %v2252_v31 = vpack.c.bf16 %v1459_v30, %v1458_v29 }
 0x131   : > { %2201 = vmatprep.subr.bf16.mxu1 %v2200_v36  ;;  %v2208_v46 = vpack.c.bf16 %v1436_v0, %v1435_v44 }
 0x132   : > { %1861 = vmatmul.mubr.f32.vlgmr.msra.gmra.mrb[0].mxu1 %v2541_v1 }
 0x133   : > { %2175 = vmatpush3.bf16.msra.mxu0 %v2172_v35  ;;  %2203 = vmatpush3.bf16.msra.mxu1 %v2200_v36  ;;  %v1462_v35 = vld [vmem:[%s2881_s2 + $0x470] sm:$0xff]  ;;  %v1463_v36 = vld [vmem:[%s2881_s2 + $0x478] sm:$0xff] }
 0x134   : > { %1930 = vmatprep.mubr.f32.mxu1 %v2554_v6  ;;  %2177 = vmatprep.subr.bf16.mxu0 %v2176_v41  ;;  %v1438_v6 = vld [vmem:[%s2881_s2 + $0x238] sm:$0xff]  ;;  %v2260_v37 = vpack.c.bf16 %v1463_v36, %v1462_v35 }
 0x135   : > { %2205 = vmatprep.subr.bf16.mxu1 %v2204_v58  ;;  %v2212_v51 = vpack.c.bf16 %v1438_v6, %v1437_v49 }
 0x137   : > { %2179 = vmatpush3.bf16.msra.mxu0 %v2176_v41  ;;  %2207 = vmatpush3.bf16.msra.mxu1 %v2204_v58 }
 0x138   : > { %2181 = vmatprep.subr.bf16.mxu0 %v2180_v45  ;;  %2209 = vmatprep.subr.bf16.mxu1 %v2208_v46 }
 0x13b   : > { %2183 = vmatpush3.bf16.msra.mxu0 %v2180_v45  ;;  %2211 = vmatpush3.bf16.msra.mxu1 %v2208_v46 }
 0x13c   : > { %2185 = vmatprep.subr.bf16.mxu0 %v2184_v50  ;;  %2213 = vmatprep.subr.bf16.mxu1 %v2212_v51 }
 0x13f   : > { %2187 = vmatpush3.bf16.msra.mxu0 %v2184_v50  ;;  %2215 = vmatpush3.bf16.msra.mxu1 %v2212_v51 }
 0x140   : > { %2189 = vmatprep.subr.bf16.mxu0 %v2188_v56  ;;  %2217 = vmatprep.subr.bf16.mxu1 %v2216_v57 }
 0x143   : > { %2191 = vmatpush3.bf16.msra.mxu0 %v2188_v56  ;;  %2219 = vmatpush3.bf16.msra.mxu1 %v2216_v57 }
 0x144   : > { %2193 = vmatprep.subr.bf16.mxu0 %v2192_v63  ;;  %2221 = vmatprep.subr.bf16.mxu1 %v2220_v2 }
 0x147   : > { %2195 = vmatpush3.bf16.msra.mxu0 %v2192_v63  ;;  %2223 = vmatpush3.bf16.msra.mxu1 %v2220_v2 }
 0x148   : > { %2197 = vmatprep.subr.bf16.mxu0 %v2196_v11  ;;  %2225 = vmatprep.subr.bf16.mxu1 %v2224_v12 }
 0x14b   : > { %2199 = vmatpush3.bf16.msra.mxu0 %v2196_v11  ;;  %2227 = vmatpush3.bf16.msra.mxu1 %v2224_v12 }
 0x14c   : > { %2229 = vmatprep.subr.bf16.mxu1 %v2228_v15 }
 0x14e   : > { %1896 = vmatmul.mubr.f32.vlgmr.msra.gmra.mrb[6].mxu0 %v2541_v1  ;;  %v1454_v1 = vld [vmem:[%s2881_s2 + $0x430] sm:$0xff] }
 0x14f   : > { %2231 = vmatpush3.bf16.msra.mxu1 %v2228_v15  ;;  %v2244_v26 = vpack.c.bf16 %v1455_v25, %v1454_v1 }
 0x150   : > { %2233 = vmatprep.subr.bf16.mxu1 %v2232_v18 }
 0x152   : > { %1931 = vmatmul.mubr.f32.vlgmr.msra.gmra.mrb[0].mxu1 %v2557_v7  ;;  %v1457_v7 = vld [vmem:[%s2881_s2 + $0x448] sm:$0xff] }
 0x153   : > { %2235 = vmatpush3.bf16.msra.mxu1 %v2232_v18  ;;  %v2248_v28 = vpack.c.bf16 %v1457_v7, %v1456_v27 }
 0x154   : > { %2237 = vmatprep.subr.bf16.mxu1 %v2236_v21 }
 0x157   : > { %2239 = vmatpush3.bf16.msra.mxu1 %v2236_v21 }
 0x158   : > { %2241 = vmatprep.subr.bf16.mxu1 %v2240_v24 }
 0x15b   : > { %2243 = vmatpush3.bf16.msra.mxu1 %v2240_v24 }
 0x15c   : > { %2245 = vmatprep.subr.bf16.mxu1 %v2244_v26 }
 0x15f   : > { %2247 = vmatpush3.bf16.msra.mxu1 %v2244_v26 }
 0x160   : > { %2249 = vmatprep.subr.bf16.mxu1 %v2248_v28 }
 0x163   : > { %2251 = vmatpush3.bf16.msra.mxu1 %v2248_v28 }
 0x164   : > { %2253 = vmatprep.subr.bf16.mxu1 %v2252_v31 }
 0x167   : > { %2255 = vmatpush3.bf16.msra.mxu1 %v2252_v31 }
 0x168   : > { %2257 = vmatprep.subr.bf16.mxu1 %v2256_v34 }
 0x16b   : > { %2259 = vmatpush3.bf16.msra.mxu1 %v2256_v34 }
 0x16c   : > { %2261 = vmatprep.subr.bf16.mxu1 %v2260_v37 }
 0x16f   : > { %2263 = vmatpush3.bf16.msra.mxu1 %v2260_v37 }
 0x1c1   : > { %v1687_v38 = vpop.f32.mrb[4].mxu0 }
 0x1c2   : > { %v463_v39 = vadd.f32 %v1687_v38, %v2546_v4  ;;  %v453_v40 = vpop.f32.mrb[5].mxu0  ;;  %v1464_v4 = vld [vmem:[%s2882_s3 + $0x2] ss:$0 sm:$0xff] }
 0x1c3   : > { %v462_v41 = vadd.f32 %v453_v40, %v2550_v5 }
 0x221   : > { %v1897_v58 = vpop.f32.mrb[6].mxu0 }
 0x222   : > { %v1156_v43 = vadd.f32 %v1897_v58, %v1447_v42  ;;  %v1037_v44 = vpop.f32.mrb[7].mxu0 }
 0x223   : > { %v1155_v0 = vadd.f32 %v1447_v42, %v1037_v44 }
 0x224   : > { %v1158_v46 = vmax.f32 %v1156_v43, 0.0 }
 0x225   : > { %v1157_v45 = vmax.f32 %v1155_v0, 0.0 }
 0x227   : > { %1965 = vmatprep.mubr.f32.mxu1 %v1157_v45 }
 0x228   : > { %1966 = vmatmul.mubr.f32.vlgmr.msra.gmra.mrb[0].mxu1 %v1158_v46 }
 0x2fb   : > { %v1967_v47 = vpop.f32.mrb[0].mxu1 }
 0x2fc   : > { %v2265_v48 = vadd.f32 %v1967_v47, %v463_v39  ;;  %v1242_v5 = vpop.f32.mrb[1].mxu1 }
 0x2fd   : > { %v2267_v49 = vadd.f32 %v1242_v5, %v462_v41 }
 0x2fe   : > { %v1259_v6 = vadd.f32 %v2265_v48, %v1464_v4 }
 0x2ff   : > { %v1258_v50 = vadd.f32 %v2267_v49, %v1464_v4 }
 0x300   : > { %v1261_v51 = vmax.f32 %v1259_v6, 0.0 }
 0x301   : > { %v1260_v52 = vmax.f32 %v1258_v50, 0.0 }
 0x302   : > { %1263 = vst [vmem:[%s197_s25 + $0x8] sm:$0xff] %v1261_v51 }
 0x303   : > { %1262 = vst [vmem:[%s197_s25] sm:$0xff] %v1260_v52 }
 0x304 PF: > { %s14_s15 = sadd.s32 1, %s2294_s15  }
 0x305   : > { %p11_p4 = scmp.ge.s32.totalorder %s14_s15, 4  }
 0x307   :  { %13 = sbr.rel (!%p11_p4) target bundleno = 1 (0x1), region = 74 }

</bundles_post_ra>
